<compile_context>
chip_gen: v7x
topology: tpu7x:2x2x1
jax: 0.10.0
libtpu: 0.0.40
codegen_flags: <defaults>
</compile_context>

<pallas_src>
import jax
import jax.numpy as jnp
from jax import lax
from jax.experimental import pallas as pl
from jax.experimental.pallas import tpu as pltpu


# -----------------------------------------------------------------------------
# Fused WithBias-LayerNorm (over channel dim) + elementwise gating multiply.
#   out = v * ( (x - mean_C(x)) * rsqrt(var_C(x) + 1e-5) * weight + bias )
# x, v are NCHW viewed as (B, C, H*W); normalization is over C (sublane axis).
# -----------------------------------------------------------------------------
def _fused_norm_gate_kernel(x_ref, v_ref, w_ref, b_ref, o_ref):
    # x_ref / v_ref: (1, C, TL) tiles;  w_ref / b_ref: (1, C, 1) full params.
    x = x_ref[0].astype(jnp.float32)                 # (C, TL)
    v = v_ref[0].astype(jnp.float32)                 # (C, TL)
    inv_c = 1.0 / x.shape[0]                         # compile-time constant
    mu = jnp.sum(x, axis=0, keepdims=True) * inv_c   # (1, TL)
    ex2 = jnp.sum(x * x, axis=0, keepdims=True) * inv_c
    var = ex2 - mu * mu                              # population var (unbiased=False)
    inv = lax.rsqrt(var + 1e-5)
    w = w_ref[0].astype(jnp.float32)                 # (C, 1) broadcast over lanes
    b = b_ref[0].astype(jnp.float32)
    y = (x - mu) * inv * w + b
    o_ref[0] = (v * y).astype(o_ref.dtype)


def fused_layernorm_gate_nchw(x, v, weight, bias):
    """Return v * WithBias_LayerNorm_over_C(x). x, v: (B, C, H, W). No transposes."""
    assert x.shape == v.shape
    B, C, H, W = x.shape
    HW = H * W
    x3 = x.reshape(B, C, HW)     # free reshape, NCHW is already contiguous this way
    v3 = v.reshape(B, C, HW)
    w3 = weight.reshape(1, C, 1)
    b3 = bias.reshape(1, C, 1)

    # ~1 MiB per input tile: near HBM roofline, and double-buffered x/v/out
    # tiles stay well inside the scoped-VMEM default on v5e/v6e/v7x.
    itemsize = jnp.dtype(x.dtype).itemsize
    tl = max(128, min(8192, (1 << 20) // max(1, C * itemsize)))
    tl = (tl // 128) * 128
    if HW % 128 == 0:
        tl = min(tl, HW)
    else:
        tl = HW  # spatial size not lane-aligned: one full-extent lane block

    grid = (B, pl.cdiv(HW, tl))  # partial last block OK: C-reduction is per lane
    out = pl.pallas_call(
        _fused_norm_gate_kernel,
        out_shape=jax.ShapeDtypeStruct((B, C, HW), x.dtype),
        grid_spec=pltpu.PrefetchScalarGridSpec(
            num_scalar_prefetch=0,
            grid=grid,
            in_specs=[
                pl.BlockSpec((1, C, tl), lambda b, j: (b, 0, j)),
                pl.BlockSpec((1, C, tl), lambda b, j: (b, 0, j)),
                pl.BlockSpec((1, C, 1), lambda b, j: (0, 0, 0)),
                pl.BlockSpec((1, C, 1), lambda b, j: (0, 0, 0)),
            ],
            out_specs=pl.BlockSpec((1, C, tl), lambda b, j: (b, 0, j)),
        ),
        compiler_params=pltpu.CompilerParams(
            dimension_semantics=("parallel", "parallel")),
    )(x3, v3, w3, b3)
    return out.reshape(B, C, H, W)


# -----------------------------------------------------------------------------
# Remaining FSAS pieces (convs / patch FFT) in plain JAX.
# -----------------------------------------------------------------------------
def _conv1x1(x, w, b=None):
    # TODO(synk): 1x1 conv is a channel matmul; left to XLA (not the hot op here).
    y = jnp.einsum('bihw,oi->bohw', x, w)
    if b is not None:
        y = y + b.reshape(1, -1, 1, 1)
    return y


def _dwconv3x3(x, w, b=None):
    # TODO(synk): depthwise 3x3 conv left to lax.conv (no clean Pallas equivalent here).
    C = x.shape[1]
    y = lax.conv_general_dilated(
        x, w, window_strides=(1, 1), padding=((1, 1), (1, 1)),
        dimension_numbers=('NCHW', 'OIHW', 'NCHW'),
        feature_group_count=C)
    if b is not None:
        y = y + b.reshape(1, -1, 1, 1)
    return y


def _to_patches(t, p):
    # 'b c (h p1) (w p2) -> b c h w p1 p2'
    B, C, H, W = t.shape
    return t.reshape(B, C, H // p, p, W // p, p).transpose(0, 1, 2, 4, 3, 5)


def _from_patches(t, H, W, p):
    # 'b c h w p1 p2 -> b c (h p1) (w p2)'
    B, C = t.shape[:2]
    return t.transpose(0, 1, 2, 4, 3, 5).reshape(B, C, H, W)


def fsas_forward(x, params, patch_size=8):
    """FSAS.forward (bias=False convs). x: (B, dim, H, W) -> (B, dim, H, W)."""
    hidden = _conv1x1(x, params['to_hidden_w'], params.get('to_hidden_b'))
    hidden = _dwconv3x3(hidden, params['to_hidden_dw_w'], params.get('to_hidden_dw_b'))
    q, k, v = jnp.split(hidden, 3, axis=1)            # each (B, 2*dim, H, W)

    B, C2, H, W = q.shape
    p = patch_size
    # TODO(synk): patchwise rfft2/irfft2 via jnp.fft (XLA FFT); no Pallas FFT primitive.
    q_fft = jnp.fft.rfft2(_to_patches(q, p).astype(jnp.float32))
    k_fft = jnp.fft.rfft2(_to_patches(k, p).astype(jnp.float32))
    out = jnp.fft.irfft2(q_fft * k_fft, s=(p, p))
    out = _from_patches(out, H, W, p).astype(x.dtype)

    # Pallas: fused WithBias LayerNorm over channels + v-gating, NCHW-native.
    gated = fused_layernorm_gate_nchw(out, v, params['norm_w'], params['norm_b'])

    return _conv1x1(gated, params['project_out_w'], params.get('project_out_b'))


if __name__ == "__main__":
    key = jax.random.PRNGKey(0)
    B, dim, H, W = 2, 4, 16, 16                       # small demo shapes
    C6, C2 = dim * 6, dim * 2
    k0, k1, k2, k3, k4, k5 = jax.random.split(key, 6)

    x = jax.random.normal(k0, (B, dim, H, W), jnp.float32)
    params = {
        # FSAS(dim, bias=False): convs have no bias.
        'to_hidden_w':    0.2 * jax.random.normal(k1, (C6, dim), jnp.float32),
        'to_hidden_dw_w': 0.2 * jax.random.normal(k2, (C6, 1, 3, 3), jnp.float32),
        'project_out_w':  0.2 * jax.random.normal(k3, (dim, C2), jnp.float32),
        'norm_w': 1.0 + 0.1 * jax.random.normal(k4, (C2,), jnp.float32),
        'norm_b':       0.1 * jax.random.normal(k5, (C2,), jnp.float32),
    }

    out = jax.block_until_ready(fsas_forward(x, params))

    # ---- pure-JAX reference (layernorm done the PyTorch way: to_3d / to_4d) ----
    hidden = _conv1x1(x, params['to_hidden_w'])
    hidden = _dwconv3x3(hidden, params['to_hidden_dw_w'])
    q, kk, v = jnp.split(hidden, 3, axis=1)
    p = 8
    o = jnp.fft.irfft2(jnp.fft.rfft2(_to_patches(q, p).astype(jnp.float32)) *
                       jnp.fft.rfft2(_to_patches(kk, p).astype(jnp.float32)), s=(p, p))
    o = _from_patches(o, H, W, p)
    ot = jnp.transpose(o, (0, 2, 3, 1))                       # to_3d-style
    mu = jnp.mean(ot, axis=-1, keepdims=True)
    var = jnp.mean((ot - mu) ** 2, axis=-1, keepdims=True)
    ln = (ot - mu) / jnp.sqrt(var + 1e-5) * params['norm_w'] + params['norm_b']
    ln = jnp.transpose(ln, (0, 3, 1, 2))                      # to_4d-style
    ref = _conv1x1(v * ln, params['project_out_w'])

    assert out.shape == (B, dim, H, W) and out.dtype == x.dtype
    err = float(jnp.max(jnp.abs(out - ref)))
    assert err < 1e-4, f"max abs err {err}"
    print("KERNEL_OK")
</pallas_src>

<mosaic_0001>
module attributes {stable_mosaic.version = 11 : i64} {
  func.func @_fused_norm_gate_kernel(%arg0: i32, %arg1: i32, %arg2: memref<1x8x256xf32, #tpu.memory_space<vmem>>, %arg3: memref<1x8x256xf32, #tpu.memory_space<vmem>>, %arg4: memref<1x8x1xf32, #tpu.memory_space<vmem>>, %arg5: memref<1x8x1xf32, #tpu.memory_space<vmem>>, %arg6: memref<1x8x256xf32, #tpu.memory_space<vmem>>) attributes {dimension_semantics = [#tpu.dimension_semantics<parallel>, #tpu.dimension_semantics<parallel>], iteration_bounds = array<i64: 2, 1>, scalar_prefetch = 0 : i64, scratch_operands = 0 : i64, tpu.core_type = #tpu.core_type<tc>, window_params = [{transform_indices = @transform_0, window_bounds = array<i64: 1, 8, 256>}, {transform_indices = @transform_1, window_bounds = array<i64: 1, 8, 256>}, {pipeline_mode = #tpu.pipeline_mode<synchronous>, transform_indices = @transform_2, window_bounds = array<i64: 1, 8, 1>}, {pipeline_mode = #tpu.pipeline_mode<synchronous>, transform_indices = @transform_3, window_bounds = array<i64: 1, 8, 1>}, {transform_indices = @transform_4, window_bounds = array<i64: 1, 8, 256>}]} {
    %c0 = arith.constant 0 : index
    %c0_0 = arith.constant 0 : index
    %c0_1 = arith.constant 0 : index
    %0 = vector.load %arg2[%c0, %c0_0, %c0_1] : memref<1x8x256xf32, #tpu.memory_space<vmem>>, vector<1x8x256xf32>
    %1 = vector.shape_cast %0 : vector<1x8x256xf32> to vector<8x256xf32>
    %c0_2 = arith.constant 0 : index
    %c0_3 = arith.constant 0 : index
    %c0_4 = arith.constant 0 : index
    %2 = vector.load %arg3[%c0_2, %c0_3, %c0_4] : memref<1x8x256xf32, #tpu.memory_space<vmem>>, vector<1x8x256xf32>
    %3 = vector.shape_cast %2 : vector<1x8x256xf32> to vector<8x256xf32>
    %cst = arith.constant dense<0.000000e+00> : vector<256xf32>
    %4 = vector.multi_reduction <add>, %1, %cst [0] : vector<8x256xf32> to vector<256xf32>
    %5 = vector.shape_cast %4 : vector<256xf32> to vector<1x256xf32>
    %cst_5 = arith.constant 1.250000e-01 : f32
    %6 = vector.broadcast %cst_5 : f32 to vector<1x256xf32>
    %7 = arith.mulf %5, %6 : vector<1x256xf32>
    %8 = arith.mulf %1, %1 : vector<8x256xf32>
    %cst_6 = arith.constant dense<0.000000e+00> : vector<256xf32>
    %9 = vector.multi_reduction <add>, %8, %cst_6 [0] : vector<8x256xf32> to vector<256xf32>
    %10 = vector.shape_cast %9 : vector<256xf32> to vector<1x256xf32>
    %cst_7 = arith.constant 1.250000e-01 : f32
    %11 = vector.broadcast %cst_7 : f32 to vector<1x256xf32>
    %12 = arith.mulf %10, %11 : vector<1x256xf32>
    %13 = arith.mulf %7, %7 : vector<1x256xf32>
    %14 = arith.subf %12, %13 : vector<1x256xf32>
    %cst_8 = arith.constant 9.99999974E-6 : f32
    %15 = vector.broadcast %cst_8 : f32 to vector<1x256xf32>
    %16 = arith.addf %14, %15 : vector<1x256xf32>
    %17 = math.rsqrt %16 : vector<1x256xf32>
    %c0_9 = arith.constant 0 : index
    %c0_10 = arith.constant 0 : index
    %c0_11 = arith.constant 0 : index
    %18 = vector.load %arg4[%c0_9, %c0_10, %c0_11] : memref<1x8x1xf32, #tpu.memory_space<vmem>>, vector<1x8x1xf32>
    %19 = vector.shape_cast %18 : vector<1x8x1xf32> to vector<8x1xf32>
    %c0_12 = arith.constant 0 : index
    %c0_13 = arith.constant 0 : index
    %c0_14 = arith.constant 0 : index
    %20 = vector.load %arg5[%c0_12, %c0_13, %c0_14] : memref<1x8x1xf32, #tpu.memory_space<vmem>>, vector<1x8x1xf32>
    %21 = vector.shape_cast %20 : vector<1x8x1xf32> to vector<8x1xf32>
    %22 = vector.broadcast %7 : vector<1x256xf32> to vector<8x256xf32>
    %23 = arith.subf %1, %22 : vector<8x256xf32>
    %24 = vector.broadcast %17 : vector<1x256xf32> to vector<8x256xf32>
    %25 = arith.mulf %23, %24 : vector<8x256xf32>
    %26 = vector.broadcast %19 : vector<8x1xf32> to vector<8x256xf32>
    %27 = arith.mulf %25, %26 : vector<8x256xf32>
    %28 = vector.broadcast %21 : vector<8x1xf32> to vector<8x256xf32>
    %29 = arith.addf %27, %28 : vector<8x256xf32>
    %30 = arith.mulf %3, %29 : vector<8x256xf32>
    %c0_15 = arith.constant 0 : index
    %c0_16 = arith.constant 0 : index
    %c0_17 = arith.constant 0 : index
    %31 = vector.load %arg6[%c0_15, %c0_16, %c0_17] : memref<1x8x256xf32, #tpu.memory_space<vmem>>, vector<1x8x256xf32>
    %32 = vector.shape_cast %31 : vector<1x8x256xf32> to vector<8x256xf32>
    %33 = vector.shape_cast %30 : vector<8x256xf32> to vector<1x8x256xf32>
    tpu.vector_store %arg6[%c0_15, %c0_16, %c0_17], %33 {strides = array<i32>} : memref<1x8x256xf32, #tpu.memory_space<vmem>>, vector<1x8x256xf32>,
    return
  }
  func.func @transform_0(%arg0: i32, %arg1: i32) -> (i32, i32, i32) {
    %c0_i32 = arith.constant 0 : i32
    %c0_i32_0 = arith.constant 0 : i32
    return %arg0, %c0_i32, %arg1 : i32, i32, i32
  }
  func.func @transform_1(%arg0: i32, %arg1: i32) -> (i32, i32, i32) {
    %c0_i32 = arith.constant 0 : i32
    %c0_i32_0 = arith.constant 0 : i32
    return %arg0, %c0_i32, %arg1 : i32, i32, i32
  }
  func.func @transform_2(%arg0: i32, %arg1: i32) -> (i32, i32, i32) {
    %c0_i32 = arith.constant 0 : i32
    %c0_i32_0 = arith.constant 0 : i32
    %c0_i32_1 = arith.constant 0 : i32
    %c0_i32_2 = arith.constant 0 : i32
    return %c0_i32, %c0_i32_0, %c0_i32_1 : i32, i32, i32
  }
  func.func @transform_3(%arg0: i32, %arg1: i32) -> (i32, i32, i32) {
    %c0_i32 = arith.constant 0 : i32
    %c0_i32_0 = arith.constant 0 : i32
    %c0_i32_1 = arith.constant 0 : i32
    %c0_i32_2 = arith.constant 0 : i32
    return %c0_i32, %c0_i32_0, %c0_i32_1 : i32, i32, i32
  }
  func.func @transform_4(%arg0: i32, %arg1: i32) -> (i32, i32, i32) {
    %c0_i32 = arith.constant 0 : i32
    %c0_i32_0 = arith.constant 0 : i32
    return %arg0, %c0_i32, %arg1 : i32, i32, i32
  }
}

</mosaic_0001>

<bundles_post_ra>
// kernel: tpu_custom_call.1
= control target key start
LH: loop header
LB: loop body
LE: loop exit
PB: predicated region body
PF: predicated region fallthrough
CT: control target
= control target key end

     0   :  { %9 = vsyncpa [#allocation3], 0  ;;  %s977_s0 = inlined_call_operand.hbm [shape: f32[2,8,256], index: 0, kind: input, shape index: {}]   ;;  %s978_s1 = inlined_call_operand.hbm [shape: f32[2,8,256], index: 1, kind: input, shape index: {}]   ;;  %s979_s2 = inlined_call_operand.vmem [shape: f32[1,8,1], index: 2, kind: input, shape index: {}]   ;;  %s980_s3 = inlined_call_operand.vmem [shape: f32[1,8,1], index: 3, kind: input, shape index: {}]   ;;  %s981_s4 = inlined_call_operand.hbm [shape: f32[2,8,256], index: 4, kind: output, shape index: {}]  }
   0x1   :  { %11 = vsyncpa [#allocation3 + $0x1], 0 }
   0x2   :  { %12 = vsyncpa [#allocation6], 0 }
   0x3   :  { %14 = vsyncpa [#allocation6 + $0x1], 0 }
   0x4   :  { %15 = vsyncpa [#allocation4], 0 }
   0x5   :  { %17 = vsyncpa [#allocation4 + $0x1], 0  ;;  %s742_s15 = smov 0   ;;  %s744_s16 = smov 0  }
   0x6   :  { %s746_s17 = smov 0   ;;  %s748_s18 = smov 0  }
   0x7   :  { %s750_s19 = smov 0   ;;  %s752_s20 = smov 0  }
   0x8 LB: > { %s470_s21 = sadd.s32 4294967295, %s711_s20   ;;  %s471_s22 = sadd.s32 4294967294, %s711_s20   ;;  %s711_s20 = sphi %s752_s20, %s23_s20   ;;  %s707_s19 = sphi %s750_s19, %s1001_s19   ;;  %s703_s18 = sphi %s748_s18, %s1000_s18   ;;  %s699_s17 = sphi %s746_s17, %s999_s17   ;;  %s695_s16 = sphi %s744_s16, %s998_s16   ;;  %s691_s15 = sphi %s742_s15, %s997_s15  }
   0x9   : > { %s35_s23 = sadd.s32 1, %s707_s19  ;;  %s44_s24 = sadd.s32 1, %s699_s17 }
   0xa   : > { %p37_p0 = scmp.ge.s32.totalorder %s35_s23, 2  ;;  %p51_p1 = scmp.ne.s32.totalorder %s699_s17, %s695_s16 }
   0xb   : > { %p52_p2 = scmp.eq.s32.totalorder %s711_s20, 0  ;;  %p57_p3 = scmp.ne.s32.totalorder %s695_s16, %s691_s15 }
   0xc   : > { %s1003_s23 = smov (%p37_p0, %s35_s23), 0  ;;  %p58_p5 = scmp.eq.s32.totalorder %s470_s21, 0 }
   0xd   : > { %p783_p4 = por %p52_p2, %p51_p1  ;;  %s39_s26 = ssub.s32 %s707_s19, %s1003_s23 }
   0xe   : > { %p153_p6 = scmp.eq.s32.totalorder %s470_s21, 1  ;;  %p42_p7 = scmp.eq.s32.totalorder %s39_s26, 0 }
   0xf   : > { %p789_p8 = por %p58_p5, %p57_p3  ;;  %p159_p10 = scmp.eq.s32.totalorder %s471_s22, 1 }
  0x10   : > { %p793_p9 = por %p153_p6, %p51_p1  ;;  %p509_p13 = scmp.lt.s32.totalorder %s711_s20, 2 }
  0x11   : > { %s985_s27 = scalar_select %p789_p8, 1, 0 }
  0x12   : > { %s986_s28 = scalar_select %p793_p9, 1, 0 }
  0x13   : > { %s798_s29 = scalar_select %p42_p7, %s699_s17, %s44_s24  }
  0x14   : > { %p800_p11 = por %p159_p10, %p57_p3  ;;  %s807_s5 = sand.u32 1, %s699_s17  }
  0x15   : > { %s474_s6 = sshll.u32 %s807_s5, 4  ;;  %s489_s7 = sshll.u32 %s707_s19, 8 }
  0x16   : > { %s987_s30 = scalar_select %p800_p11, 1, 0 }
  0x17   : > { %s816_s10 = scalar_lea.hbm %s977_s0, %s489_s7  ;;  %s189_s11 = scalar_lea.vmem [#allocation2], %s474_s6 }
  0x18   : > { %s199_s12 = sshll.u32 %s189_s11, 4  ;;  %p824_p0 = pnand %p509_p13, %p783_p4  ;;  %s820_s12 = int_to_ptr.vmem [resolvable:$true] %s199_s12 }
  0x19   : > { %s186_s14 = scalar_lea.sflag [#allocation3], %s807_s5  ;;  %s565_s21 = scalar_lea.hbm %s816_s10, 256 }
  0x1a   : > { %p566_p3 = scmp.ne.s32.totalorder %s816_s10, %s565_s21  ;;  %p567_p5 = pneg %p824_p0 }
  0x1b   : > { %s570_s25 = scalar_lea.hbm %s977_s0, 512  ;;  %p571_p4 = scmp.lt.u32.totalorder %s816_s10, %s977_s0 }
  0x1c   : > { %p568_p6 = pnand %p567_p5, %p566_p3  ;;  %p572_p10 = scmp.lt.u32.totalorder %s570_s25, %s565_s21 }
  0x1d   : > { %p574_p12 = scmp.lt.u32.totalorder %s565_s21, %s816_s10 }
  0x1e   : > { %p569_p7 = pneg %p568_p6  ;;  %p573_p13 = por %p572_p10, %p571_p4 }
  0x20   : > { %p575_p1 = por %p574_p12, %p573_p13 }
  0x22   : > { %p576_p2 = pnand %p575_p1, %p569_p7 }
  0x24   : > { %579 = shalt.err (!%p576_p2)
}
  0x25   : > { %s580_s9 = scalar_lea.vmem %s820_s12, 256  ;;  %s713_s11 = smov [#allocation2]  }
  0x26   : > { %p581_p3 = scmp.ne.s32.totalorder %s820_s12, %s580_s9  ;;  %s585_s22 = sshll.u32 %s713_s11, 4  ;;  %s586_s22 = int_to_ptr.vmem [resolvable:$false] %s585_s22 }
  0x27   : > { %s587_s24 = scalar_lea.vmem %s586_s22, 512  ;;  %p588_p9 = scmp.lt.s32.totalorder %s820_s12, %s586_s22 }
  0x28   : > { %p583_p6 = pnand %p581_p3, %p567_p5  ;;  %p589_p4 = scmp.lt.s32.totalorder %s587_s24, %s580_s9 }
  0x2a   : > { %p584_p11 = pneg %p583_p6  ;;  %p590_p10 = por %p589_p4, %p588_p9 }
  0x2c   : > { %p591_p12 = pnand %p590_p10, %p584_p11 }
  0x2e   : > { %594 = shalt.err (!%p591_p12)
}
  0x2f   : > { %501 = dma.hbm_to_vmem [thread:$0]  (!%p824_p0), %s816_s10, 256, %s820_s12, %s186_s14  }
  0x30   : > { %p989_p1 = scmp.lt.s32.totalorder %s711_s20, 3  ;;  %p990_p2 = scmp.ge.s32.totalorder %s711_s20, 1 }
  0x31   : > { %s869_s8 = scalar_lea.hbm %s978_s1, %s489_s7  ;;  %s210_s9 = scalar_lea.vmem [#allocation5], %s474_s6 }
  0x32   : > { %p860_p7 = pnand %p990_p2, %p989_p1  ;;  %s220_s11 = sshll.u32 %s210_s9, 4  ;;  %s221_s11 = int_to_ptr.vmem [resolvable:$true] %s220_s11 }
  0x33   : > { %s207_s10 = scalar_lea.sflag [#allocation6], %s807_s5  ;;  %s595_s12 = scalar_lea.hbm %s869_s8, 256 }
  0x34   : > { %s991_s21 = scalar_select %p860_p7, 1, 0 }
  0x35   : > { %p596_p9 = scmp.ne.s32.totalorder %s869_s8, %s595_s12  ;;  %s600_s7 = scalar_lea.hbm %s978_s1, 512 }
  0x36   : > { %p601_p3 = scmp.lt.u32.totalorder %s869_s8, %s978_s1  ;;  %p602_p6 = scmp.lt.u32.totalorder %s600_s7, %s595_s12 }
  0x37   : > { %p598_p11 = pnand %p596_p9, %p567_p5  ;;  %p604_p10 = scmp.lt.u32.totalorder %s595_s12, %s869_s8 }
  0x38   : > { %p603_p4 = por %p602_p6, %p601_p3 }
  0x39   : > { %p599_p13 = pneg %p598_p11 }
  0x3a   : > { %p605_p12 = por %p604_p10, %p603_p4 }
  0x3c   : > { %p606_p1 = pnand %p605_p12, %p599_p13 }
  0x3e   : > { %609 = shalt.err (!%p606_p1)
}
  0x3f   : > { %s610_s5 = scalar_lea.vmem %s221_s11, 256  ;;  %s714_s6 = smov [#allocation5]  }
  0x40   : > { %p611_p2 = scmp.ne.s32.totalorder %s221_s11, %s610_s5  ;;  %s615_s26 = sshll.u32 %s714_s6, 4  ;;  %s616_s26 = int_to_ptr.vmem [resolvable:$false] %s615_s26 }
  0x41   : > { %s617_s9 = scalar_lea.vmem %s616_s26, 512  ;;  %p618_p8 = scmp.lt.s32.totalorder %s221_s11, %s616_s26 }
  0x42   : > { %p613_p9 = pnand %p611_p2, %p567_p5  ;;  %p619_p7 = scmp.lt.s32.totalorder %s617_s9, %s610_s5 }
  0x44   : > { %p614_p11 = pneg %p613_p9  ;;  %p620_p3 = por %p619_p7, %p618_p8 }
  0x46   : > { %p621_p6 = pnand %p620_p3, %p614_p11 }
  0x48   : > { %624 = shalt.err (!%p621_p6)
}
  0x49   : > { %504 = dma.hbm_to_vmem [thread:$0]  (!%p824_p0), %s869_s8, 256, %s221_s11, %s207_s10  }
  0x4a   : > { %p992_p13 = scmp.ne.s32.totalorder %s991_s21, 0 }
  0x4b   : > { %s896_s12 = sand.u32 (!%p992_p13), 1, %s695_s16   ;;  %p993_p8 = scmp.ne.s32.totalorder (!%p992_p13), %s985_s27, 0 }
  0x4c   : > { %229 = sbr.rel (%p992_p13) target bundleno = 238 (0xee), region = 36  ;;  %s899_s14 = sshll.u32 (!%p992_p13), %s896_s12, 4 }
  0x4d   : > { %s232_s22 = scalar_lea.sflag (!%p992_p13), [#allocation3], %s896_s12  ;;  %s235_s7 = scalar_lea.vmem (!%p992_p13), [#allocation2], %s899_s14 }
  0x53   : > { %678 = dma.done.wait (%p993_p8), %s232_s22, 256  }
  0x54   : > { %680 = vsyncadd (%p993_p8), %s232_s22, 4294967040  ;;  %s241_s13 = scalar_lea.sflag [#allocation6], %s896_s12  ;;  %s244_s21 = scalar_lea.vmem [#allocation5], %s899_s14 }
  0x55   : > { %682 = dma.done.wait (%p993_p8), %s241_s13, 256  }
  0x56   : > { %684 = vsyncadd (%p993_p8), %s241_s13, 4294967040  ;;  %v715_v0 = vmov 0   ;;  %v319_v1 = vld [vmem:[%s979_s2] sm:$0xff]  ;;  %v278_v4 = vld [vmem:[%s235_s7 + $0x8] sm:$0xff]  ;;  %s491_s27 = sshll.u32 %s703_s18, 8  ;;  %s273_s25 = scalar_lea.vmem [#allocation7], %s899_s14 }
  0x57   : > { %560 = vset.pattern.permute.xlu0 %v715_v0  ;;  %v320_v2 = vld [vmem:[%s980_s3] sm:$0xff]  ;;  %v287_v7 = vrot.slane %v278_v4, 4  ;;  %v296_v8 = vmul.f32 %v278_v4, %v278_v4  ;;  %v280_v52 = vld [vmem:[%s244_s21 + $0x8] sm:$0xff]  ;;  %s360_s5 = sshll.u32 %s273_s25, 4  ;;  %s928_s9 = scalar_lea.hbm %s981_s4, %s491_s27  ;;  %s930_s5 = int_to_ptr.vmem [resolvable:$true] %s360_s5 }
  0x58   : > { %327 = vperm.xlu0 %560, %v319_v1   ;;  %v277_v3 = vld [vmem:[%s235_s7] sm:$0xff]  ;;  %s344_s22 = scalar_lea.sflag [#allocation4], %s896_s12  ;;  %s625_s18 = scalar_lea.vmem %s930_s5, 256 }
  0x59   : > { %v281_v5 = vrot.slane %v277_v3, 4  ;;  %v295_v6 = vmul.f32 %v277_v3, %v277_v3  ;;  %v288_v11 = vadd.f32 %v287_v7, %v278_v4  ;;  %v303_v12 = vrot.slane %v296_v8, 4  ;;  %v279_v51 = vld [vmem:[%s244_s21] sm:$0xff]  ;;  %p626_p0 = scmp.ne.s32.totalorder %s930_s5, %s625_s18  ;;  %p994_p5 = scmp.ne.s32.totalorder %s986_s28, 0 }
  0x5a   : > { %s716_s14 = smov [#allocation7]  }
  0x5b   : > { %v282_v9 = vadd.f32 %v281_v5, %v277_v3  ;;  %v297_v10 = vrot.slane %v295_v6, 4  ;;  %v289_v15 = vrot.slane %v288_v11, 2  ;;  %v304_v16 = vadd.f32 %v303_v12, %v296_v8  ;;  %p627_p7 = pnand %p626_p0, %p994_p5  ;;  %s629_s7 = sshll.u32 %s716_s14, 4  ;;  %s630_s7 = int_to_ptr.vmem [resolvable:$false] %s629_s7 }
  0x5c   : > { %334 = vperm.xlu0 %560, %v320_v2   ;;  %s631_s13 = scalar_lea.vmem %s630_s7, 512  ;;  %p632_p10 = scmp.lt.s32.totalorder %s930_s5, %s630_s7 }
  0x5d   : > { %v283_v13 = vrot.slane %v282_v9, 2  ;;  %v298_v14 = vadd.f32 %v297_v10, %v295_v6  ;;  %v290_v19 = vadd.f32 %v289_v15, %v288_v11  ;;  %v305_v20 = vrot.slane %v304_v16, 2  ;;  %p628_p4 = pneg %p627_p7  ;;  %p633_p12 = scmp.lt.s32.totalorder %s631_s13, %s625_s18 }
  0x5f   : > { %v284_v17 = vadd.f32 %v283_v13, %v282_v9  ;;  %v299_v18 = vrot.slane %v298_v14, 2  ;;  %v291_v23 = vrot.slane %v290_v19, 1  ;;  %v306_v24 = vadd.f32 %v305_v20, %v304_v16  ;;  %p634_p1 = por %p633_p12, %p632_p10 }
  0x61   : > { %v285_v21 = vrot.slane %v284_v17, 1  ;;  %v300_v22 = vadd.f32 %v299_v18, %v298_v14  ;;  %v292_v27 = vadd.f32 %v291_v23, %v290_v19  ;;  %v307_v28 = vrot.slane %v306_v24, 1  ;;  %p635_p2 = pnand %p634_p1, %p628_p4 }
  0x63   : > { %v286_v25 = vadd.f32 %v285_v21, %v284_v17  ;;  %v301_v26 = vrot.slane %v300_v22, 1  ;;  %v294_v31 = vmul.f32 0.125, %v292_v27  ;;  %v308_v32 = vadd.f32 %v307_v28, %v306_v24 }
  0x65   : > { %v293_v29 = vmul.f32 0.125, %v286_v25  ;;  %v302_v30 = vadd.f32 %v301_v26, %v300_v22  ;;  %v310_v35 = vmul.f32 0.125, %v308_v32  ;;  %v312_v36 = vmul.f32 %v294_v31, %v294_v31 }
  0x66   : > { %v322_v43 = vsub.f32 %v278_v4, %v294_v31 }
  0x67   : > { %v309_v33 = vmul.f32 0.125, %v302_v30  ;;  %v311_v34 = vmul.f32 %v293_v29, %v293_v29  ;;  %v314_v38 = vsub.f32 %v310_v35, %v312_v36  ;;  %v321_v42 = vsub.f32 %v277_v3, %v293_v29 }
  0x69   : > { %v313_v37 = vsub.f32 %v309_v33, %v311_v34  ;;  %v316_v40 = vadd.f32 1e-05, %v314_v38 }
  0x6b   : > { %v315_v39 = vadd.f32 1e-05, %v313_v37 }
  0x6d   : > { %561 = vrsqrt.f32 %v315_v39 }
  0x6e   : > { %563 = vrsqrt.f32 %v316_v40 }
  0x77   : > { %v562_v41 = vpop.eup %561 }
  0x78   : > { %v564_v44 = vpop.eup %563  ;;  %v323_v45 = vmul.f32 %v562_v41, %v321_v42 }
  0x79   : > { %v324_v46 = vmul.f32 %v564_v44, %v322_v43 }
  0xd7   : > { %v328_v47 = vpop.permute.xlu0 %327 }
  0xd8   : > { %v330_v48 = vmul.f32 %v328_v47, %v323_v45  ;;  %v331_v49 = vmul.f32 %v328_v47, %v324_v46 }
  0xdb   : > { %v335_v50 = vpop.permute.xlu0 %334 }
  0xdc   : > { %v337_v53 = vadd.f32 %v335_v50, %v330_v48  ;;  %v338_v54 = vadd.f32 %v335_v50, %v331_v49 }
  0xde   : > { %v339_v55 = vmul.f32 %v337_v53, %v279_v51  ;;  %v340_v56 = vmul.f32 %v338_v54, %v280_v52 }
  0xe0   : > { %341 = vst [vmem:[%s273_s25] sm:$0xff] %v339_v55  ;;  %342 = vst [vmem:[%s273_s25 + $0x8] sm:$0xff] %v340_v56 }
  0xe1   : > { %638 = shalt.err (!%p635_p2)
}
  0xe2   : > { %s639_s12 = scalar_lea.hbm %s928_s9, 256  ;;  %s643_s11 = scalar_lea.hbm %s981_s4, 512 }
  0xe3   : > { %p640_p9 = scmp.ne.s32.totalorder %s928_s9, %s639_s12  ;;  %p644_p6 = scmp.lt.u32.totalorder %s928_s9, %s981_s4 }
  0xe4   : > { %p645_p13 = scmp.lt.u32.totalorder %s643_s11, %s639_s12  ;;  %p647_p0 = scmp.lt.u32.totalorder %s639_s12, %s928_s9 }
  0xe5   : > { %p641_p11 = pnand %p640_p9, %p994_p5 }
  0xe6   : > { %p646_p8 = por %p645_p13, %p644_p6 }
  0xe7   : > { %p642_p3 = pneg %p641_p11 }
  0xe8   : > { %p648_p7 = por %p647_p0, %p646_p8 }
  0xea   : > { %p649_p4 = pnand %p648_p7, %p642_p3 }
  0xec   : > { %652 = shalt.err (!%p649_p4)
}
  0xed   : > { %496 = dma.vmem_to_hbm [thread:$0]  (%p994_p5), %s930_s5, 256, %s928_s9, %s344_s22  }
  0xee PF: > { %s372_s27 = sand.u32 1, %s691_s15   ;;  %p995_p10 = scmp.ne.s32.totalorder %s987_s30, 0 }
  0xef   : > { %p996_p12 = scmp.ge.s32.totalorder %s711_s20, 2  ;;  %s373_s25 = scalar_lea.sflag [#allocation4], %s372_s27 }
  0xf1   : > { %p506_p1 = pnand %p996_p12, %p995_p10 }
  0xf3   : > { %686 = dma.done.wait (!%p506_p1), %s373_s25, 256  }
  0xf4   : > { %688 = vsyncadd (!%p506_p1), %s373_s25, 4294967040  ;;  %s23_s20 = sadd.s32 1, %s711_s20   ;;  %s997_s15 = smov %s695_s16 }
  0xf5   : > { %p20_p2 = scmp.ge.s32.totalorder %s23_s20, 4   ;;  %s998_s16 = smov %s699_s17 }
  0xf6   : > { %s999_s17 = smov %s798_s29  ;;  %s1000_s18 = smov %s707_s19 }
  0xf7   : > { %s1001_s19 = smov %s1003_s23  ;;  %22 = sbr.rel (!%p20_p2) target bundleno = 8 (0x8), region = 94 }
  0xfe   :  { %378 = vsyncpa [#allocation3], 1 }
  0xff   :  { %380 = vsyncpa [#allocation3 + $0x1], 1 }
 0x100   :  { %381 = vsyncpa [#allocation6], 1 }
 0x101   :  { %383 = vsyncpa [#allocation6 + $0x1], 1 }
 0x102   :  { %384 = vsyncpa [#allocation4], 1 }
 0x103   :  { %386 = vsyncpa [#allocation4 + $0x1], 1 }

</bundles_post_ra>
